<compile_context>
chip_gen: v5e
topology: v5e:2x2
jax: 0.10.0
libtpu: 0.0.40
codegen_flags: <defaults>
</compile_context>

<pallas_src>
import functools

import jax
import jax.numpy as jnp
from jax import lax
from jax.experimental import pallas as pl
from jax.experimental.pallas import tpu as pltpu

_LANES = 128  # TPU vreg lane width; chunk size for the v1 two-level scan.


def _cummax_lanes(x):
    """Inclusive prefix-max along the last (lane) axis of a 2-D block.

    Log-depth Hillis-Steele scan (pltpu.roll on the XLU + compare/select/max on
    the VPU).  Only used on the fallback path (V not a multiple of 128), where
    V is small and the scan is just a handful of steps.
    """
    V = x.shape[-1]
    lane = lax.broadcasted_iota(jnp.int32, x.shape, x.ndim - 1)  # hoisted once
    cm = x
    k = 1
    while k < V:
        # pltpu.roll == jnp.roll semantics: rolled[j] = cm[(j - k) % V]
        rolled = pltpu.roll(cm, shift=k, axis=x.ndim - 1)
        cm = jnp.maximum(cm, jnp.where(lane >= k, rolled, -jnp.inf))
        k *= 2
    return cm


def _softermax_v1_chunked_kernel(x_ref, y_ref, *, num_chunks, newton):
    """v1 softermax over one (tS, V) block, V = num_chunks * 128.

    Pass 1 (fori over 128-lane chunks): 7 within-chunk Hillis-Steele roll/max
    steps confined to one vreg segment, combined with a serial (tS,1)
    cross-chunk running max; accumulates the non-rescaled denominator
    d = sum_j 2^(x_j - prefixmax_j).
    Pass 2: numerator 2^(x - rowmax) * (1/d) written back chunk-by-chunk
    (lane-dense 128-wide stores).  rowmax is the scan's final carry.
    """
    tS = x_ref.shape[0]
    lane = lax.broadcasted_iota(jnp.int32, (tS, _LANES), 1)  # hoisted (no CSE in loop)

    def denom_body(c, carry):
        d, m_run = carry                           # m_run = max over all previous chunks
        off = pl.multiple_of(c * _LANES, _LANES)
        xc = x_ref[:, pl.ds(off, _LANES)].astype(jnp.float32)   # (tS, 128)
        # Within-chunk inclusive prefix max: log2(128) = 7 roll/max steps.
        cm = xc
        k = 1
        while k < _LANES:
            rolled = pltpu.roll(cm, shift=k, axis=1)
            cm = jnp.maximum(cm, jnp.where(lane >= k, rolled, -jnp.inf))
            k *= 2
        pm = jnp.maximum(cm, m_run)                # global inclusive prefix max in this chunk
        d = d + jnp.sum(jnp.exp2(xc - pm), axis=-1, keepdims=True)
        m_run = jnp.maximum(m_run, cm[:, _LANES - 1:_LANES])    # chunk max -> running max
        return d, m_run

    d0 = jnp.zeros((tS, 1), jnp.float32)
    m0 = jnp.full((tS, 1), -jnp.inf, jnp.float32)
    d, m = lax.fori_loop(0, num_chunks, denom_body, (d0, m0))

    r = pl.reciprocal(d, approx=True)              # EUP slot
    if newton:                                     # one Newton step for f32-grade 1/d
        r = r * (2.0 - d * r)

    def num_body(c, carry):
        off = pl.multiple_of(c * _LANES, _LANES)
        xc = x_ref[:, pl.ds(off, _LANES)].astype(jnp.float32)
        y_ref[:, pl.ds(off, _LANES)] = (jnp.exp2(xc - m) * r).astype(y_ref.dtype)
        return carry

    lax.fori_loop(0, num_chunks, num_body, 0)


def _softermax_full_kernel(x_ref, y_ref, *, version, newton):
    """Full-width softermax over one (tS, V) block (v2, and v1 when V % 128 != 0)."""
    x = x_ref[...].astype(jnp.float32)             # (tS, V): S on sublanes, V on lanes
    V = x.shape[-1]
    if version == 1:
        # v1 denominator: sum_j 2^(x_j - prefixmax_j); terms are NOT rescaled
        # when the running max grows, so it needs the prefix max.
        cm = _cummax_lanes(x)
        m = cm[:, V - 1:V]                         # last lane == global row max (free)
        d = jnp.sum(jnp.exp2(x - cm), axis=-1, keepdims=True)
        e = jnp.exp2(x - m)
    else:
        # v2 recurrence == standard online base-2 softmax -> two-pass form.
        m = jnp.max(x, axis=-1, keepdims=True)
        e = jnp.exp2(x - m)
        d = jnp.sum(e, axis=-1, keepdims=True)
    r = pl.reciprocal(d, approx=True)
    if newton:
        r = r * (2.0 - d * r)
    y_ref[...] = (e * r).astype(y_ref.dtype)


def _chip_budgets():
    """(per-block f32-equivalent byte budget, vmem_limit_bytes) per generation.

    v5e/v6e: 128 MiB VMEM -> bigger tiles amortize the ~0.35 us/step grid
    overhead.  v7x: 64 MiB per TensorCore -> keep the smaller sizing so
    double-buffered I/O + in-kernel f32 temporaries stay under the scoped limit.
    """
    vmem_cap = None
    try:
        vmem_cap = getattr(pltpu.get_tpu_info(), "vmem_capacity_bytes", None)
    except Exception:
        vmem_cap = None
    if vmem_cap is not None and vmem_cap >= 100 * 1024 * 1024:   # v5e / v6e
        return 4 * 1024 * 1024, 64 * 1024 * 1024
    return 2 * 1024 * 1024, 32 * 1024 * 1024                      # v7x / unknown


def _pick_block_rows(B, S, V, budget_bytes):
    """Pick the S tile (multiple of 8 or == S) for the (1, tS, V) block."""
    cap = max(8, (budget_bytes // (V * 4)) // 8 * 8)
    # Guarantee >= ~8 total grid steps so v7x's 2 TensorCores both get work and
    # the input/output DMA pipeline has steps to overlap with.
    min_steps = 8
    if B < min_steps and S > 8:
        s_steps = -(-min_steps // B)               # ceil(min_steps / B)
        cap = min(cap, max(8, (S // s_steps) // 8 * 8))
    if S <= cap:
        return S
    ts = cap
    if S % ts != 0:
        # Prefer a divisor of S near the cap (avoids the masked-store tail
        # block); otherwise keep the cap -- one padded tail block is harmless.
        for cand in range(ts, max(8, ts // 2) - 1, -8):
            if S % cand == 0:
                return cand
    return ts


def softermax(x, version=1, *, block_rows=None):
    """Base-2 "softermax" over the last axis of a (B, S, V) array.

    Notes:
      * v2 follows the intended online-softmax rescale 2**(m0 - mj); the literal
        PyTorch v2 recurrence (2**(mj - m0)) NaNs via 0*inf on the first step.
      * v1 rows whose running prefix max is -inf (leading -inf inputs) produce
        NaN via (-inf) - (-inf), matching the PyTorch reference.
    """
    if version not in (1, 2):
        # TODO(synk): version 3 applies `>>` (bit shift) to float tensors, which is
        # invalid even in the reference PyTorch; no well-defined semantics to port.
        raise ValueError("Unsupported Softermax version")
    B, S, V = x.shape

    budget_bytes, vmem_limit = _chip_budgets()
    if block_rows is None:
        ts = _pick_block_rows(B, S, V, budget_bytes)
    else:
        ts = block_rows
        if ts != S and (ts % 8 != 0 or ts > S):
            raise ValueError(
                f"block_rows must be a multiple of 8 and <= S, or equal S; got {ts}")

    # TODO(synk): for V < 128 the lane axis is underutilized (masked partial
    # stores); a lane-packed layout (128 // V rows per vreg with segmented
    # reductions) would lift lane utilization for small-V workloads.

    newton = bool(x.dtype == jnp.float32)          # f32-grade reciprocal only when needed
    use_chunked = version == 1 and V % _LANES == 0
    if use_chunked:
        kern = functools.partial(_softermax_v1_chunked_kernel,
                                 num_chunks=V // _LANES, newton=newton)
    else:
        kern = functools.partial(_softermax_full_kernel, version=version, newton=newton)

    grid = (B, pl.cdiv(S, ts))
    return pl.pallas_call(
        kern,
        # Keep I/O in the input dtype: bf16 inputs stay bf16 in HBM/VMEM (halves
        # HBM traffic for this memory-bound kernel); upcast happens in-kernel.
        out_shape=jax.ShapeDtypeStruct((B, S, V), x.dtype),
        grid_spec=pltpu.PrefetchScalarGridSpec(
            num_scalar_prefetch=0,
            grid=grid,
            in_specs=[pl.BlockSpec((None, ts, V), lambda b, s: (b, s, 0))],
            out_specs=pl.BlockSpec((None, ts, V), lambda b, s: (b, s, 0)),
        ),
        compiler_params=pltpu.CompilerParams(
            # Independent output tiles on both axes -> fully parallel grid
            # (shards across the 2 TensorCores on v7x).
            dimension_semantics=("parallel", "parallel"),
            vmem_limit_bytes=vmem_limit,
        ),
    )(x)


# ---------------- pure-JAX references (mirror the PyTorch loops) ----------------
def _softermax_v1_ref(x):
    xf = x.astype(jnp.float32)
    V = xf.shape[-1]
    m = jnp.full(xf.shape[:-1], -jnp.inf, jnp.float32)
    d = jnp.zeros(xf.shape[:-1], jnp.float32)
    for j in range(V):
        mj = jnp.maximum(m, xf[:, :, j])
        d = d + 2.0 ** (xf[:, :, j] - mj)
        m = mj
    return (2.0 ** (xf - m[..., None]) / d[..., None]).astype(x.dtype)


def _softermax_v2_ref(x):
    # The literal PyTorch v2 writes `d * 2**(mj - m0)`, which with m0 = -inf at the
    # first step is 0 * inf = NaN for every row; the intended (and previously
    # accepted) semantics is the standard online-softmax rescale 2**(m0 - mj),
    # which is mathematically the plain base-2 softmax implemented by the kernel.
    xf = x.astype(jnp.float32)
    V = xf.shape[-1]
    m = jnp.full(xf.shape[:-1], -jnp.inf, jnp.float32)
    d = jnp.zeros(xf.shape[:-1], jnp.float32)
    for j in range(V):
        mj = jnp.maximum(m, xf[:, :, j])
        d = d * 2.0 ** (m - mj) + 2.0 ** (xf[:, :, j] - mj)
        m = mj
    return (2.0 ** (xf - m[..., None]) / d[..., None]).astype(x.dtype)


if __name__ == "__main__":
    key = jax.random.PRNGKey(0)

    # Small shapes implied by the module's (B, S, V) layout (V < 128 fallback path).
    B, S, V = 2, 8, 32
    x = jax.random.normal(key, (B, S, V), dtype=jnp.float32)
    y1 = jax.block_until_ready(softermax(x, version=1))
    assert jnp.allclose(y1, _softermax_v1_ref(x), atol=2e-3, rtol=2e-3), "v1 mismatch"
    y2 = jax.block_until_ready(softermax(x, version=2))
    assert jnp.allclose(y2, _softermax_v2_ref(x), atol=2e-3, rtol=2e-3), "v2 mismatch"

    # Lane-dense V (multiple of 128): exercises the chunked v1 two-level scan
    # (2 chunks), the v2 full-width path, and the multi-step (B, S//tS) grid.
    xl = jax.random.normal(jax.random.PRNGKey(1), (2, 256, 256), dtype=jnp.float32)
    for ver in (1, 2):
        ref = _softermax_v1_ref(xl) if ver == 1 else _softermax_v2_ref(xl)
        out = jax.block_until_ready(softermax(xl, version=ver))
        assert jnp.allclose(out, ref, atol=2e-3, rtol=2e-3), f"v{ver} large mismatch"

    # bf16 I/O plumbing (compute stays f32 in-kernel).
    xb = jax.random.normal(jax.random.PRNGKey(2), (2, 64, 256), dtype=jnp.bfloat16)
    for ver in (1, 2):
        ref = (_softermax_v1_ref(xb) if ver == 1 else _softermax_v2_ref(xb)).astype(jnp.float32)
        out = jax.block_until_ready(softermax(xb, version=ver)).astype(jnp.float32)
        assert jnp.allclose(out, ref, atol=2e-2, rtol=2e-2), f"v{ver} bf16 mismatch"

    print("KERNEL_OK")
</pallas_src>

<mosaic_0001>
module attributes {stable_mosaic.version = 11 : i64} {
  func.func @_softermax_full_kernel(%arg0: i32, %arg1: i32, %arg2: memref<1x8x32xf32, #tpu.memory_space<vmem>>, %arg3: memref<1x8x32xf32, #tpu.memory_space<vmem>>) attributes {dimension_semantics = [#tpu.dimension_semantics<parallel>, #tpu.dimension_semantics<parallel>], iteration_bounds = array<i64: 2, 1>, scalar_prefetch = 0 : i64, scratch_operands = 0 : i64, tpu.core_type = #tpu.core_type<tc>, window_params = [{transform_indices = @transform_0, window_bounds = array<i64: 1, 8, 32>}, {transform_indices = @transform_1, window_bounds = array<i64: 1, 8, 32>}]} {
    %c0 = arith.constant 0 : index
    %c0_0 = arith.constant 0 : index
    %c0_1 = arith.constant 0 : index
    %0 = vector.load %arg2[%c0, %c0_0, %c0_1] : memref<1x8x32xf32, #tpu.memory_space<vmem>>, vector<1x8x32xf32>
    %1 = vector.shape_cast %0 : vector<1x8x32xf32> to vector<8x32xf32>
    %2 = tpu.iota {dimensions = array<i32: 1>} : vector<8x32xi32>
    %c1_i32 = arith.constant 1 : i32
    %3 = tpu.dynamic_rotate %1 by %c1_i32 dim 1 : vector<8x32xf32>, i32 -> vector<8x32xf32>
    %c1_i32_2 = arith.constant 1 : i32
    %4 = vector.broadcast %c1_i32_2 : i32 to vector<8x32xi32>
    %5 = arith.cmpi sge, %2, %4 : vector<8x32xi32>
    %cst = arith.constant 0xFF800000 : f32
    %6 = vector.broadcast %cst : f32 to vector<8x32xf32>
    %7 = arith.select %5, %3, %6 : vector<8x32xi1>, vector<8x32xf32>
    %8 = arith.maximumf %1, %7 : vector<8x32xf32>
    %c2_i32 = arith.constant 2 : i32
    %9 = tpu.dynamic_rotate %8 by %c2_i32 dim 1 : vector<8x32xf32>, i32 -> vector<8x32xf32>
    %c2_i32_3 = arith.constant 2 : i32
    %10 = vector.broadcast %c2_i32_3 : i32 to vector<8x32xi32>
    %11 = arith.cmpi sge, %2, %10 : vector<8x32xi32>
    %cst_4 = arith.constant 0xFF800000 : f32
    %12 = vector.broadcast %cst_4 : f32 to vector<8x32xf32>
    %13 = arith.select %11, %9, %12 : vector<8x32xi1>, vector<8x32xf32>
    %14 = arith.maximumf %8, %13 : vector<8x32xf32>
    %c4_i32 = arith.constant 4 : i32
    %15 = tpu.dynamic_rotate %14 by %c4_i32 dim 1 : vector<8x32xf32>, i32 -> vector<8x32xf32>
    %c4_i32_5 = arith.constant 4 : i32
    %16 = vector.broadcast %c4_i32_5 : i32 to vector<8x32xi32>
    %17 = arith.cmpi sge, %2, %16 : vector<8x32xi32>
    %cst_6 = arith.constant 0xFF800000 : f32
    %18 = vector.broadcast %cst_6 : f32 to vector<8x32xf32>
    %19 = arith.select %17, %15, %18 : vector<8x32xi1>, vector<8x32xf32>
    %20 = arith.maximumf %14, %19 : vector<8x32xf32>
    %c8_i32 = arith.constant 8 : i32
    %21 = tpu.dynamic_rotate %20 by %c8_i32 dim 1 : vector<8x32xf32>, i32 -> vector<8x32xf32>
    %c8_i32_7 = arith.constant 8 : i32
    %22 = vector.broadcast %c8_i32_7 : i32 to vector<8x32xi32>
    %23 = arith.cmpi sge, %2, %22 : vector<8x32xi32>
    %cst_8 = arith.constant 0xFF800000 : f32
    %24 = vector.broadcast %cst_8 : f32 to vector<8x32xf32>
    %25 = arith.select %23, %21, %24 : vector<8x32xi1>, vector<8x32xf32>
    %26 = arith.maximumf %20, %25 : vector<8x32xf32>
    %c16_i32 = arith.constant 16 : i32
    %27 = tpu.dynamic_rotate %26 by %c16_i32 dim 1 : vector<8x32xf32>, i32 -> vector<8x32xf32>
    %c16_i32_9 = arith.constant 16 : i32
    %28 = vector.broadcast %c16_i32_9 : i32 to vector<8x32xi32>
    %29 = arith.cmpi sge, %2, %28 : vector<8x32xi32>
    %cst_10 = arith.constant 0xFF800000 : f32
    %30 = vector.broadcast %cst_10 : f32 to vector<8x32xf32>
    %31 = arith.select %29, %27, %30 : vector<8x32xi1>, vector<8x32xf32>
    %32 = arith.maximumf %26, %31 : vector<8x32xf32>
    %33 = vector.extract_strided_slice %32 {offsets = [0, 31], sizes = [8, 1], strides = [1, 1]} : vector<8x32xf32> to vector<8x1xf32>
    %34 = arith.subf %1, %32 : vector<8x32xf32>
    %35 = math.exp2 %34 : vector<8x32xf32>
    %cst_11 = arith.constant dense<0.000000e+00> : vector<8xf32>
    %36 = vector.multi_reduction <add>, %35, %cst_11 [1] : vector<8x32xf32> to vector<8xf32>
    %37 = vector.shape_cast %36 : vector<8xf32> to vector<8x1xf32>
    %38 = vector.broadcast %33 : vector<8x1xf32> to vector<8x32xf32>
    %39 = arith.subf %1, %38 : vector<8x32xf32>
    %40 = math.exp2 %39 : vector<8x32xf32>
    %41 = tpu.reciprocal %37 {approx = true} : vector<8x1xf32> -> vector<8x1xf32>
    %42 = arith.mulf %37, %41 : vector<8x1xf32>
    %cst_12 = arith.constant 2.000000e+00 : f32
    %43 = vector.broadcast %cst_12 : f32 to vector<8x1xf32>
    %44 = arith.subf %43, %42 : vector<8x1xf32>
    %45 = arith.mulf %41, %44 : vector<8x1xf32>
    %46 = vector.broadcast %45 : vector<8x1xf32> to vector<8x32xf32>
    %47 = arith.mulf %40, %46 : vector<8x32xf32>
    %c0_13 = arith.constant 0 : index
    %c0_14 = arith.constant 0 : index
    %c0_15 = arith.constant 0 : index
    %48 = vector.load %arg3[%c0_13, %c0_14, %c0_15] : memref<1x8x32xf32, #tpu.memory_space<vmem>>, vector<1x8x32xf32>
    %49 = vector.shape_cast %48 : vector<1x8x32xf32> to vector<8x32xf32>
    %50 = vector.shape_cast %47 : vector<8x32xf32> to vector<1x8x32xf32>
    tpu.vector_store %arg3[%c0_13, %c0_14, %c0_15], %50 {strides = array<i32>} : memref<1x8x32xf32, #tpu.memory_space<vmem>>, vector<1x8x32xf32>,
    return
  }
  func.func @transform_0(%arg0: i32, %arg1: i32) -> (i32, i32, i32) {
    %c0_i32 = arith.constant 0 : i32
    %c0_i32_0 = arith.constant 0 : i32
    return %arg0, %arg1, %c0_i32 : i32, i32, i32
  }
  func.func @transform_1(%arg0: i32, %arg1: i32) -> (i32, i32, i32) {
    %c0_i32 = arith.constant 0 : i32
    %c0_i32_0 = arith.constant 0 : i32
    return %arg0, %arg1, %c0_i32 : i32, i32, i32
  }
}

</mosaic_0001>

<bundles_post_ra>
// kernel: tpu_custom_call.1
= control target key start
LH: loop header
LB: loop body
LE: loop exit
PB: predicated region body
PF: predicated region fallthrough
CT: control target
= control target key end

     0   :  { %6 = vsyncpa [#allocation3], 0  ;;  %s711_s0 = inlined_call_operand.hbm [shape: f32[2,8,32], index: 0, kind: input, shape index: {}]   ;;  %s712_s1 = inlined_call_operand.hbm [shape: f32[2,8,32], index: 1, kind: output, shape index: {}]  }
   0x1   :  { %8 = vsyncpa [#allocation3 + $0x1], 0 }
   0x2   :  { %9 = vsyncpa [#allocation4], 0 }
   0x3   :  { %11 = vsyncpa [#allocation4 + $0x1], 0  ;;  %s557_s6 = smov 0   ;;  %s559_s7 = smov 0  }
   0x4   :  { %s561_s8 = smov 0   ;;  %s563_s9 = smov 0  }
   0x5   :  { %s565_s10 = smov 0   ;;  %s567_s11 = smov 0  }
   0x6 LB: > { %s336_s12 = sadd.s32 4294967295, %s538_s11   ;;  %s337_s13 = sadd.s32 4294967294, %s538_s11   ;;  %s538_s11 = sphi %s567_s11, %s17_s11   ;;  %s534_s10 = sphi %s565_s10, %s721_s10   ;;  %s530_s9 = sphi %s563_s9, %s720_s9   ;;  %s526_s8 = sphi %s561_s8, %s719_s8   ;;  %s522_s7 = sphi %s559_s7, %s718_s7   ;;  %s518_s6 = sphi %s557_s6, %s717_s6  }
   0x7   : > { %s29_s14 = sadd.s32 1, %s534_s10  ;;  %s38_s15 = sadd.s32 1, %s526_s8 }
   0x8   : > { %p31_p0 = scmp.ge.s32.totalorder %s29_s14, 2  ;;  %p45_p1 = scmp.ne.s32.totalorder %s526_s8, %s522_s7 }
   0x9   : > { %p46_p2 = scmp.eq.s32.totalorder %s538_s11, 0  ;;  %p51_p3 = scmp.ne.s32.totalorder %s522_s7, %s518_s6 }
   0xa   : > { %s723_s14 = smov (%p31_p0, %s29_s14), 0  ;;  %p52_p5 = scmp.eq.s32.totalorder %s336_s12, 0 }
   0xb   : > { %p598_p4 = por %p46_p2, %p45_p1  ;;  %s33_s17 = ssub.s32 %s534_s10, %s723_s14 }
   0xc   : > { %p77_p6 = scmp.eq.s32.totalorder %s336_s12, 1  ;;  %p36_p7 = scmp.eq.s32.totalorder %s33_s17, 0 }
   0xd   : > { %p604_p8 = por %p52_p5, %p51_p3  ;;  %p83_p10 = scmp.eq.s32.totalorder %s337_s13, 1 }
   0xe   : > { %p608_p9 = por %p77_p6, %p45_p1  ;;  %p339_p12 = scmp.ge.s32.totalorder %s538_s11, 2 }
   0xf   : > { %s613_s20 = scalar_select %p36_p7, %s526_s8, %s38_s15  }
  0x10   : > { %p615_p11 = por %p83_p10, %p51_p3  ;;  %p361_p13 = scmp.lt.s32.totalorder %s538_s11, 2 }
  0x11   : > { %s103_s22 = sand.u32 1, %s526_s8   ;;  %s341_s24 = sshll.u32 %s534_s10, 3 }
  0x12   : > { %s340_s23 = sshll.u32 %s103_s22, 3  ;;  %s112_s27 = scalar_lea.hbm %s711_s0, %s341_s24 }
  0x13   : > { %s107_s28 = scalar_lea.vmem [#allocation2], %s340_s23  ;;  %s114_s30 = sshll.u32 %s112_s27, 4  ;;  %s115_s30 = int_to_ptr.hbm [resolvable:$true] %s114_s30 }
  0x14   : > { %s116_s29 = sshll.u32 %s107_s28, 4  ;;  %p354_p0 = pnand %p361_p13, %p598_p4  ;;  %s117_s29 = int_to_ptr.vmem [resolvable:$true] %s116_s29 }
  0x15   : > { %p342_p1 = scmp.ge.s32.totalorder %s538_s11, 1  ;;  %p121_p2 = scmp.lt.s32.totalorder %s538_s11, 3 }
  0x16   : > { %s104_s2 = scalar_lea.sflag [#allocation3], %s103_s22 }
  0x17   : > { %356 = dma.hbm_to_vmem [thread:$0]  (!%p354_p0), %s115_s30, 128, %s117_s29, %s104_s2  }
  0x18   : > { %p122_p3 = pnand %p342_p1, %p121_p2 }
  0x19   : > { %s631_s3 = sand.u32 (!%p122_p3), 1, %s522_s7  }
  0x1a   : > { %125 = sbr.rel (%p122_p3) target bundleno = 1807 (0x70f), region = 24  ;;  %s343_s4 = sshll.u32 (!%p122_p3), %s631_s3, 3 }
  0x1b   : > { %s128_s5 = scalar_lea.sflag (!%p122_p3), [#allocation3], %s631_s3  ;;  %s131_s12 = scalar_lea.vmem (!%p122_p3), [#allocation2], %s343_s4 }
  0x1f   : > { %509 = dma.done.wait (%p604_p8), %s128_s5, 128  }
  0x20   : > { %511 = vsyncadd (%p604_p8), %s128_s5, 4294967168  ;;  %v641_v0 = vld [vmem:[%s131_s12] sm:$0xff]  ;;  %s540_s13 = smov 32   ;;  %vm154_vm0 = vcmask 1047808   ;;  %s541_s15 = smov 97   ;;  %v152_v5 = vlaneseq  ;;  %v546_v35 = vmov 31  }
  0x21   : > { %155 = vrot.lane.b32.xlu0 %v641_v0, %s540_s13  ;;  %s542_s16 = smov 98   ;;  %s543_s17 = smov 100   ;;  %418 = vset.pattern.permute.xlu1 %v546_v35  ;;  %vm222_vm6 = vcmask 261120  }
  0x22   : > { %v153_v6 = vand.u32 127, %v152_v5  ;;  %s544_s18 = smov 104   ;;  %s545_s22 = smov 112   ;;  %419 = vset.pattern.permute.xlu0 %v546_v35 }
  0x23   : > { %s346_s23 = sshll.u32 %s530_s9, 3  ;;  %s150_s27 = scalar_lea.vmem [#allocation5], %s343_s4 }
  0x24   : > { %vm161_vm1 = vcmp.ge.s32.totalorder %v153_v6, 1  ;;  %vm174_vm2 = vcmp.ge.s32.totalorder %v153_v6, 2  ;;  %vm187_vm3 = vcmp.ge.s32.totalorder %v153_v6, 4  ;;  %vm200_vm4 = vcmp.ge.s32.totalorder %v153_v6, 8  ;;  %s251_s26 = scalar_lea.hbm %s712_s1, %s346_s23  ;;  %s253_s28 = sshll.u32 %s150_s27, 4  ;;  %s254_s28 = int_to_ptr.vmem [resolvable:$true] %s253_s28 }
  0x25   : > { %vm213_vm5 = vcmp.ge.s32.totalorder %v153_v6, 16  ;;  %s255_s29 = sshll.u32 %s251_s26, 4  ;;  %s240_s9 = scalar_lea.sflag [#allocation4], %s631_s3  ;;  %s256_s29 = int_to_ptr.hbm [resolvable:$true] %s255_s29 }
  0x26   : > { %s470_s30 = sshra.s32 %s256_s29, 4  ;;  %s476_s4 = scalar_lea.hbm %s712_s1, 16  ;;  %s471_s30 = int_to_ptr.hbm [resolvable:$true] %s470_s30 }
  0x27   : > { %s472_s2 = scalar_lea.hbm %s471_s30, 8  ;;  %p477_p7 = scmp.lt.s32.totalorder %s471_s30, %s712_s1 }
  0x28   : > { %p473_p4 = scmp.ne.s32.totalorder %s471_s30, %s472_s2  ;;  %p478_p8 = scmp.lt.s32.totalorder %s476_s4, %s472_s2 }
  0x2a   : > { %p474_p5 = pnand %p473_p4, %p608_p9  ;;  %p479_p10 = por %p478_p8, %p477_p7 }
  0x2c   : > { %p475_p6 = pneg %p474_p5 }
  0x2e   : > { %p480_p13 = pnand %p479_p10, %p475_p6 }
  0x93   : > { %v156_v1 = vpop.permute.xlu0 %155 }
  0x94   : > { %v157_v2 = vsel %vm154_vm0, %v156_v1, %v641_v0 }
  0x95   : > { %158 = vrot.lane.b32.xlu0 %v157_v2, %s540_s13 }
 0x107   : > { %v159_v3 = vpop.permute.xlu0 %158 }
 0x108   : > { %v160_v4 = vsel %vm154_vm0, %v159_v3, %v641_v0 }
 0x109   : > { %163 = vrot.lane.b32.xlu1 %v160_v4, %s541_s15 }
 0x17b   : > { %v164_v7 = vpop.permute.xlu1 %163 }
 0x17c   : > { %v166_v8 = vsel %vm161_vm1, %v164_v7, -inf }
 0x17d   : > { %v167_v9 = vmax.f32 %v641_v0, %v166_v8 }
 0x17f   : > { %168 = vrot.lane.b32.xlu1 %v167_v9, %s540_s13 }
 0x1f1   : > { %v169_v10 = vpop.permute.xlu1 %168 }
 0x1f2   : > { %v170_v11 = vsel %vm154_vm0, %v169_v10, %v167_v9 }
 0x1f3   : > { %171 = vrot.lane.b32.xlu2 %v170_v11, %s540_s13 }
 0x24d   : > { %v172_v12 = vpop.permute.xlu2 %171 }
 0x24e   : > { %v173_v13 = vsel %vm154_vm0, %v172_v12, %v167_v9 }
 0x24f   : > { %176 = vrot.lane.b32.xlu2 %v173_v13, %s542_s16 }
 0x2a9   : > { %v177_v14 = vpop.permute.xlu2 %176 }
 0x2aa   : > { %v179_v15 = vsel %vm174_vm2, %v177_v14, -inf }
 0x2ab   : > { %v180_v16 = vmax.f32 %v167_v9, %v179_v15 }
 0x2ad   : > { %181 = vrot.lane.b32.xlu0 %v180_v16, %s540_s13 }
 0x31f   : > { %v182_v17 = vpop.permute.xlu0 %181 }
 0x320   : > { %v183_v18 = vsel %vm154_vm0, %v182_v17, %v180_v16 }
 0x321   : > { %184 = vrot.lane.b32.xlu1 %v183_v18, %s540_s13 }
 0x393   : > { %v185_v19 = vpop.permute.xlu1 %184 }
 0x394   : > { %v186_v20 = vsel %vm154_vm0, %v185_v19, %v180_v16 }
 0x395   : > { %189 = vrot.lane.b32.xlu2 %v186_v20, %s543_s17 }
 0x3ef   : > { %v190_v21 = vpop.permute.xlu2 %189 }
 0x3f0   : > { %v192_v22 = vsel %vm187_vm3, %v190_v21, -inf }
 0x3f1   : > { %v193_v23 = vmax.f32 %v180_v16, %v192_v22 }
 0x3f3   : > { %194 = vrot.lane.b32.xlu0 %v193_v23, %s540_s13 }
 0x465   : > { %v195_v24 = vpop.permute.xlu0 %194 }
 0x466   : > { %v196_v25 = vsel %vm154_vm0, %v195_v24, %v193_v23 }
 0x467   : > { %197 = vrot.lane.b32.xlu1 %v196_v25, %s540_s13 }
 0x4d9   : > { %v198_v26 = vpop.permute.xlu1 %197 }
 0x4da   : > { %v199_v27 = vsel %vm154_vm0, %v198_v26, %v193_v23 }
 0x4db   : > { %202 = vrot.lane.b32.xlu2 %v199_v27, %s544_s18 }
 0x535   : > { %v203_v28 = vpop.permute.xlu2 %202 }
 0x536   : > { %v205_v29 = vsel %vm200_vm4, %v203_v28, -inf }
 0x537   : > { %v206_v30 = vmax.f32 %v193_v23, %v205_v29 }
 0x539   : > { %207 = vrot.lane.b32.xlu0 %v206_v30, %s540_s13 }
 0x5ab   : > { %v208_v31 = vpop.permute.xlu0 %207 }
 0x5ac   : > { %v209_v32 = vsel %vm154_vm0, %v208_v31, %v206_v30 }
 0x5ad   : > { %210 = vrot.lane.b32.xlu1 %v209_v32, %s540_s13 }
 0x61f   : > { %v211_v33 = vpop.permute.xlu1 %210 }
 0x620   : > { %v212_v34 = vsel %vm154_vm0, %v211_v33, %v206_v30 }
 0x621   : > { %215 = vrot.lane.b32.xlu2 %v212_v34, %s545_s22 }
 0x67b   : > { %v216_v36 = vpop.permute.xlu2 %215 }
 0x67c   : > { %v218_v37 = vsel %vm213_vm5, %v216_v36, -inf }
 0x67d   : > { %v219_v38 = vmax.f32 %v206_v30, %v218_v37 }
 0x67f   : > { %v220_v39 = vsub.f32 %v641_v0, %v219_v38  ;;  %228 = vperm.xlu1 %418, %v219_v38  }
 0x681   : > { %420 = vpow2.f32 %v220_v39 }
 0x687   : > { %v421_v40 = vpop.eup %420 }
 0x688   : > { %v223_v41 = vsel %vm222_vm6, %v421_v40, 0.0 }
 0x689   : > { %224 = vadd.xlane.f32.xlu0 %v223_v41 }
 0x6f1   : > { %v229_v42 = vpop.permute.xlu1 %228 }
 0x6f2   : > { %v231_v44 = vsub.f32 %v641_v0, %v229_v42 }
 0x6fc   : > { %v225_v43 = vpop.xlane.xlu0 %224 }
 0x6fd   : > { %422 = vrcp.f32 %v225_v43 }
 0x6fe   : > { %424 = vpow2.f32 %v231_v44 }
 0x703   : > { %v423_v45 = vpop.eup %422 }
 0x704   : > { %v234_v46 = vmul.f32 %v423_v45, %v225_v43  ;;  %v425_v49 = vpop.eup %424 }
 0x706   : > { %v235_v47 = vsub.f32 2.0, %v234_v46 }
 0x708   : > { %v236_v48 = vmul.f32 %v423_v45, %v235_v47 }
 0x70a   : > { %v237_v50 = vmul.f32 %v425_v49, %v236_v48 }
 0x70c   : > { %238 = vst.msk [vmem:[%s150_s27] sm:$0xff] %vm222_vm6, %v237_v50 }
 0x70d   : > { %483 = shalt.err (!%p480_p13)
}
 0x70e   : > { %351 = dma.vmem_to_hbm [thread:$0]  (%p608_p9), %s254_s28, 128, %s256_s29, %s240_s9  }
 0x70f PF: > { %s267_s3 = sand.u32 1, %s518_s6   ;;  %p358_p0 = pnand %p339_p12, %p615_p11 }
 0x710   : > { %s268_s16 = scalar_lea.sflag [#allocation4], %s267_s3 }
 0x711   : > { %p359_p1 = pneg %p358_p0 }
 0x713   : > { %513 = dma.done.wait (%p359_p1), %s268_s16, 128  }
 0x714   : > { %515 = vsyncadd (%p359_p1), %s268_s16, 4294967168  ;;  %s17_s11 = sadd.s32 1, %s538_s11   ;;  %s717_s6 = smov %s522_s7 }
 0x715   : > { %p14_p2 = scmp.ge.s32.totalorder %s17_s11, 4   ;;  %s718_s7 = smov %s526_s8 }
 0x716   : > { %s719_s8 = smov %s613_s20  ;;  %s720_s9 = smov %s534_s10 }
 0x717   : > { %s721_s10 = smov %s723_s14  ;;  %16 = sbr.rel (!%p14_p2) target bundleno = 6 (0x6), region = 69 }
 0x71c   :  { %274 = vsyncpa [#allocation3], 1 }
 0x71d   :  { %276 = vsyncpa [#allocation3 + $0x1], 1 }
 0x71e   :  { %277 = vsyncpa [#allocation4], 1 }
 0x71f   :  { %279 = vsyncpa [#allocation4 + $0x1], 1 }

</bundles_post_ra>
